<compile_context>
chip_gen: v7x
topology: tpu7x:2x2x1
jax: 0.10.0
libtpu: 0.0.40
codegen_flags: <defaults>
</compile_context>

<pallas_src>
import jax
import jax.numpy as jnp
from jax import lax
from jax.experimental import pallas as pl
from jax.experimental.pallas import tpu as pltpu


# Both f32 accumulators together must stay <= ~half the 256 KiB vreg file:
#   2 * TB * TCo * F * 4 bytes <= 128 KiB  =>  TB * TCo * F <= 16384 elements.
_ACC_BUDGET_ELEMS = 16384
# Fully unroll the Ci accumulation loop (static slices, straight-line code) up to
# this channel count; beyond it use a rolled fori_loop with dynamic slices.
_UNROLL_CI_MAX = 32


def _spectral_mul_kernel(xr_ref, xi_ref, wr_ref, wi_ref, or_ref, oi_ref):
    """One (Co-tile, B-tile) step of the complex channel contraction.

    xr/xi : (TB, Ci, F)   real/imag of truncated spectrum (lane-dense F)
    wr/wi : (Ci, TCo, F)
    or/oi : (TB, TCo, F)
    out[b,o,f] = sum_i x[b,i,f] * w[i,o,f]   (complex)
    """
    tb, ci, f = xr_ref.shape
    tco = wr_ref.shape[1]

    acc_r = jnp.zeros((tb, tco, f), jnp.float32)
    acc_i = jnp.zeros((tb, tco, f), jnp.float32)

    def step(i, acc_r, acc_i):
        # (TB, 1, F) and (1, TCo, F) operand slices -> broadcast MAC into the
        # (TB, TCo, F) accumulators; no O(TB*Ci*TCo*F) intermediate ever exists.
        xr = xr_ref[:, pl.ds(i, 1), :]
        xi = xi_ref[:, pl.ds(i, 1), :]
        wr = wr_ref[pl.ds(i, 1), :, :]
        wi = wi_ref[pl.ds(i, 1), :, :]
        acc_r = acc_r + (xr * wr - xi * wi)
        acc_i = acc_i + (xr * wi + xi * wr)
        return acc_r, acc_i

    if ci <= _UNROLL_CI_MAX:
        # Static slices; accumulators are loop-carried vregs in straight-line code.
        for i in range(ci):
            acc_r, acc_i = step(i, acc_r, acc_i)
    else:
        acc_r, acc_i = lax.fori_loop(
            0, ci, lambda i, c: step(i, c[0], c[1]), (acc_r, acc_i))

    or_ref[...] = acc_r
    oi_ref[...] = acc_i


def _largest_divisor_leq(n, cap):
    for d in range(min(n, max(cap, 1)), 0, -1):
        if n % d == 0:
            return d
    return 1


def _choose_co_tiling(co):
    """Return (co_padded, tco) with tco a multiple of 8 or the full extent."""
    if co <= 16:
        return co, co                      # full-extent block is always legal
    co_pad = pl.cdiv(co, 8) * 8            # pad so a multiple-of-8 tile divides it
    tco = 16 if co_pad % 16 == 0 else 8
    return co_pad, tco


def _vmem_limit_bytes(tb, tco, ci, f):
    """Generation-aware VMEM budget: double-buffered I/O tiles + headroom."""
    per_step = 4 * f * (2 * 2 * tb * ci      # xr, xi tiles, double-buffered
                        + 2 * 2 * ci * tco   # wr, wi tiles
                        + 2 * 2 * tb * tco)  # out_r, out_i tiles
    try:
        physical = pltpu.get_tpu_info().vmem_capacity_bytes
    except Exception:
        physical = 64 * 1024 * 1024          # v7x per-TC minimum as a safe default
    cap = int(physical * 0.8)                # leave compiler scratch / sem headroom
    want = 2 * per_step + (8 << 20)          # headroom for spills / internal scratch
    return int(max(min(max(want, 32 << 20), cap), per_step + (4 << 20)))


def spectral_compl_mul(xr, xi, wr, wi):
    """Complex einsum 'bif,iof->bof' via Pallas.

    xr, xi : float32 [B, Ci, F]   (F lane-dense, multiple of 128)
    wr, wi : float32 [Ci, Co, F]
    returns (out_r, out_i) : float32 [B, Co, F]
    """
    B, Ci, F = xr.shape
    Co = wr.shape[1]

    co_pad, tco = _choose_co_tiling(Co)
    if co_pad != Co:
        pad = ((0, 0), (0, co_pad - Co), (0, 0))
        wr = jnp.pad(wr, pad)
        wi = jnp.pad(wi, pad)

    # Size TB so the two f32 accumulators stay within the vreg budget.
    tb = _largest_divisor_leq(B, max(1, _ACC_BUDGET_ELEMS // (tco * F)))

    nco = co_pad // tco
    nb = B // tb

    # Traffic-aware loop order: the operand whose redundant re-streaming would be
    # more expensive stays resident across the inner grid axis (its block index
    # does not change there, so Pallas skips the re-fetch).
    bytes_x = 2 * B * Ci * F * 4
    bytes_w = 2 * Ci * co_pad * F * 4
    if (nco - 1) * bytes_x <= (nb - 1) * bytes_w:
        # Weights resident across inner B steps; x re-streamed nco times.
        grid = (nco, nb)
        x_map = lambda co, b: (b, 0, 0)
        w_map = lambda co, b: (0, co, 0)
        o_map = lambda co, b: (b, co, 0)
    else:
        # x resident across inner Co steps; weights re-streamed nb times.
        grid = (nb, nco)
        x_map = lambda b, co: (b, 0, 0)
        w_map = lambda b, co: (0, co, 0)
        o_map = lambda b, co: (b, co, 0)

    x_spec = pl.BlockSpec((tb, Ci, F), x_map)     # second-minor = full Ci extent
    w_spec = pl.BlockSpec((Ci, tco, F), w_map)    # second-minor tco: mult of 8 / full
    o_spec = pl.BlockSpec((tb, tco, F), o_map)

    out_shape = (jax.ShapeDtypeStruct((B, co_pad, F), jnp.float32),
                 jax.ShapeDtypeStruct((B, co_pad, F), jnp.float32))

    out_r, out_i = pl.pallas_call(
        _spectral_mul_kernel,
        grid=grid,
        in_specs=[x_spec, x_spec, w_spec, w_spec],
        out_specs=(o_spec, o_spec),
        out_shape=out_shape,
        compiler_params=pltpu.CompilerParams(
            # Both axes write disjoint output tiles -> shardable across v7x's 2 TCs.
            dimension_semantics=("parallel", "parallel"),
            vmem_limit_bytes=_vmem_limit_bytes(tb, tco, Ci, F),
        ),
    )(xr, xi, wr, wi)

    if co_pad != Co:
        out_r = out_r[:, :Co, :]
        out_i = out_i[:, :Co, :]
    return out_r, out_i


def spectral_conv2d(x, weights1, weights2, modes1, modes2):
    """Forward pass of SpectralConv2d. x is NCHW float32: [B, Cin, H, W]."""
    B, Ci, H, W = x.shape
    Co = weights1.shape[1]
    m1, m2 = modes1, modes2
    nfreq = m1 * m2
    nfreq2 = 2 * nfreq                       # both corners share one frequency axis
    F = pl.cdiv(nfreq2, 128) * 128           # lane-dense padded frequency axis

    # TODO(synk): rfft2/irfft2 have no Pallas equivalent; they stay in plain JAX.
    x_ft = jnp.fft.rfft2(x, s=(H, W))        # [B, Ci, H, W//2+1] complex64

    # Concatenate the two truncated mode corners along the frequency axis, then pad.
    x_low = x_ft[:, :, :m1, :m2].reshape(B, Ci, nfreq)
    x_high = x_ft[:, :, H - m1:, :m2].reshape(B, Ci, nfreq)
    x_modes = jnp.concatenate([x_low, x_high], axis=-1)            # [B, Ci, 2*m1*m2]
    x_modes = jnp.pad(x_modes, ((0, 0), (0, 0), (0, F - nfreq2)))

    w_modes = jnp.concatenate([weights1.reshape(Ci, Co, nfreq),
                               weights2.reshape(Ci, Co, nfreq)], axis=-1)
    w_modes = jnp.pad(w_modes, ((0, 0), (0, 0), (0, F - nfreq2)))  # [Ci, Co, F]

    xr = jnp.real(x_modes).astype(jnp.float32)
    xi = jnp.imag(x_modes).astype(jnp.float32)
    wr = jnp.real(w_modes).astype(jnp.float32)
    wi = jnp.imag(w_modes).astype(jnp.float32)

    out_r, out_i = spectral_compl_mul(xr, xi, wr, wi)              # [B, Co, F]

    out_c = lax.complex(out_r[..., :nfreq2], out_i[..., :nfreq2])
    out_low = out_c[..., :nfreq].reshape(B, Co, m1, m2)
    out_high = out_c[..., nfreq:].reshape(B, Co, m1, m2)

    out_ft = jnp.zeros((B, Co, H, W // 2 + 1), dtype=jnp.complex64)
    out_ft = out_ft.at[:, :, :m1, :m2].set(out_low)
    out_ft = out_ft.at[:, :, H - m1:, :m2].set(out_high)

    return jnp.fft.irfft2(out_ft, s=(H, W))  # [B, Co, H, W] float32


def _reference(x, weights1, weights2, modes1, modes2):
    """Pure-JAX reference reproducing the PyTorch forward."""
    B, Ci, H, W = x.shape
    Co = weights1.shape[1]
    x_ft = jnp.fft.rfft2(x, s=(H, W))
    out_ft = jnp.zeros((B, Co, H, W // 2 + 1), dtype=jnp.complex64)
    out_ft = out_ft.at[:, :, :modes1, :modes2].set(
        jnp.einsum('bixy,ioxy->boxy', x_ft[:, :, :modes1, :modes2], weights1))
    out_ft = out_ft.at[:, :, H - modes1:, :modes2].set(
        jnp.einsum('bixy,ioxy->boxy', x_ft[:, :, H - modes1:, :modes2], weights2))
    return jnp.fft.irfft2(out_ft, s=(H, W))


if __name__ == "__main__":
    # Small shapes consistent with the module.
    B, Cin, Cout = 2, 4, 4
    H, W = 16, 16
    modes1, modes2 = 4, 4

    key = jax.random.PRNGKey(0)
    kx, k1r, k1i, k2r, k2i = jax.random.split(key, 5)

    x = jax.random.normal(kx, (B, Cin, H, W), dtype=jnp.float32)

    # Deterministic weight init mirroring:
    #   scale * torch.rand(in, out, m1, m2, dtype=cfloat)
    scale = 1.0 / (Cin * Cout)
    w_shape = (Cin, Cout, modes1, modes2)
    weights1 = scale * lax.complex(
        jax.random.uniform(k1r, w_shape, jnp.float32),
        jax.random.uniform(k1i, w_shape, jnp.float32))
    weights2 = scale * lax.complex(
        jax.random.uniform(k2r, w_shape, jnp.float32),
        jax.random.uniform(k2i, w_shape, jnp.float32))

    out = spectral_conv2d(x, weights1, weights2, modes1, modes2)
    out = jax.block_until_ready(out)

    ref = jax.block_until_ready(_reference(x, weights1, weights2, modes1, modes2))
    assert out.shape == (B, Cout, H, W), out.shape
    assert out.dtype == jnp.float32, out.dtype
    assert jnp.allclose(out, ref, atol=1e-5, rtol=1e-5), "mismatch vs reference"

    print("KERNEL_OK")
</pallas_src>

<mosaic_0001>
module attributes {stable_mosaic.version = 11 : i64} {
  func.func @_spectral_mul_kernel(%arg0: i32, %arg1: i32, %arg2: memref<2x4x128xf32, #tpu.memory_space<vmem>>, %arg3: memref<2x4x128xf32, #tpu.memory_space<vmem>>, %arg4: memref<4x4x128xf32, #tpu.memory_space<vmem>>, %arg5: memref<4x4x128xf32, #tpu.memory_space<vmem>>, %arg6: memref<2x4x128xf32, #tpu.memory_space<vmem>>, %arg7: memref<2x4x128xf32, #tpu.memory_space<vmem>>) attributes {dimension_semantics = [#tpu.dimension_semantics<parallel>, #tpu.dimension_semantics<parallel>], iteration_bounds = array<i64: 1, 1>, scalar_prefetch = 0 : i64, scratch_operands = 0 : i64, tpu.core_type = #tpu.core_type<tc>, window_params = [{transform_indices = @transform_0, window_bounds = array<i64: 2, 4, 128>}, {transform_indices = @transform_1, window_bounds = array<i64: 2, 4, 128>}, {transform_indices = @transform_2, window_bounds = array<i64: 4, 4, 128>}, {transform_indices = @transform_3, window_bounds = array<i64: 4, 4, 128>}, {transform_indices = @transform_4, window_bounds = array<i64: 2, 4, 128>}, {transform_indices = @transform_5, window_bounds = array<i64: 2, 4, 128>}]} {
    %cst = arith.constant 0.000000e+00 : f32
    %0 = vector.broadcast %cst : f32 to vector<2x4x128xf32>
    %cst_0 = arith.constant 0.000000e+00 : f32
    %1 = vector.broadcast %cst_0 : f32 to vector<2x4x128xf32>
    %c0 = arith.constant 0 : index
    %c0_1 = arith.constant 0 : index
    %c0_2 = arith.constant 0 : index
    %2 = vector.load %arg2[%c0, %c0_1, %c0_2] : memref<2x4x128xf32, #tpu.memory_space<vmem>>, vector<2x1x128xf32>
    %c0_3 = arith.constant 0 : index
    %c0_4 = arith.constant 0 : index
    %c0_5 = arith.constant 0 : index
    %3 = vector.load %arg3[%c0_3, %c0_4, %c0_5] : memref<2x4x128xf32, #tpu.memory_space<vmem>>, vector<2x1x128xf32>
    %c0_6 = arith.constant 0 : index
    %c0_7 = arith.constant 0 : index
    %c0_8 = arith.constant 0 : index
    %4 = vector.load %arg4[%c0_6, %c0_7, %c0_8] : memref<4x4x128xf32, #tpu.memory_space<vmem>>, vector<1x4x128xf32>
    %c0_9 = arith.constant 0 : index
    %c0_10 = arith.constant 0 : index
    %c0_11 = arith.constant 0 : index
    %5 = vector.load %arg5[%c0_9, %c0_10, %c0_11] : memref<4x4x128xf32, #tpu.memory_space<vmem>>, vector<1x4x128xf32>
    %6 = vector.broadcast %2 : vector<2x1x128xf32> to vector<2x4x128xf32>
    %7 = vector.broadcast %4 : vector<1x4x128xf32> to vector<2x4x128xf32>
    %8 = arith.mulf %6, %7 : vector<2x4x128xf32>
    %9 = vector.broadcast %3 : vector<2x1x128xf32> to vector<2x4x128xf32>
    %10 = vector.broadcast %5 : vector<1x4x128xf32> to vector<2x4x128xf32>
    %11 = arith.mulf %9, %10 : vector<2x4x128xf32>
    %12 = arith.subf %8, %11 : vector<2x4x128xf32>
    %13 = arith.addf %0, %12 : vector<2x4x128xf32>
    %14 = vector.broadcast %2 : vector<2x1x128xf32> to vector<2x4x128xf32>
    %15 = vector.broadcast %5 : vector<1x4x128xf32> to vector<2x4x128xf32>
    %16 = arith.mulf %14, %15 : vector<2x4x128xf32>
    %17 = vector.broadcast %3 : vector<2x1x128xf32> to vector<2x4x128xf32>
    %18 = vector.broadcast %4 : vector<1x4x128xf32> to vector<2x4x128xf32>
    %19 = arith.mulf %17, %18 : vector<2x4x128xf32>
    %20 = arith.addf %16, %19 : vector<2x4x128xf32>
    %21 = arith.addf %1, %20 : vector<2x4x128xf32>
    %c0_12 = arith.constant 0 : index
    %c1 = arith.constant 1 : index
    %c0_13 = arith.constant 0 : index
    %22 = vector.load %arg2[%c0_12, %c1, %c0_13] : memref<2x4x128xf32, #tpu.memory_space<vmem>>, vector<2x1x128xf32>
    %c0_14 = arith.constant 0 : index
    %c1_15 = arith.constant 1 : index
    %c0_16 = arith.constant 0 : index
    %23 = vector.load %arg3[%c0_14, %c1_15, %c0_16] : memref<2x4x128xf32, #tpu.memory_space<vmem>>, vector<2x1x128xf32>
    %c1_17 = arith.constant 1 : index
    %c0_18 = arith.constant 0 : index
    %c0_19 = arith.constant 0 : index
    %24 = vector.load %arg4[%c1_17, %c0_18, %c0_19] : memref<4x4x128xf32, #tpu.memory_space<vmem>>, vector<1x4x128xf32>
    %c1_20 = arith.constant 1 : index
    %c0_21 = arith.constant 0 : index
    %c0_22 = arith.constant 0 : index
    %25 = vector.load %arg5[%c1_20, %c0_21, %c0_22] : memref<4x4x128xf32, #tpu.memory_space<vmem>>, vector<1x4x128xf32>
    %26 = vector.broadcast %22 : vector<2x1x128xf32> to vector<2x4x128xf32>
    %27 = vector.broadcast %24 : vector<1x4x128xf32> to vector<2x4x128xf32>
    %28 = arith.mulf %26, %27 : vector<2x4x128xf32>
    %29 = vector.broadcast %23 : vector<2x1x128xf32> to vector<2x4x128xf32>
    %30 = vector.broadcast %25 : vector<1x4x128xf32> to vector<2x4x128xf32>
    %31 = arith.mulf %29, %30 : vector<2x4x128xf32>
    %32 = arith.subf %28, %31 : vector<2x4x128xf32>
    %33 = arith.addf %13, %32 : vector<2x4x128xf32>
    %34 = vector.broadcast %22 : vector<2x1x128xf32> to vector<2x4x128xf32>
    %35 = vector.broadcast %25 : vector<1x4x128xf32> to vector<2x4x128xf32>
    %36 = arith.mulf %34, %35 : vector<2x4x128xf32>
    %37 = vector.broadcast %23 : vector<2x1x128xf32> to vector<2x4x128xf32>
    %38 = vector.broadcast %24 : vector<1x4x128xf32> to vector<2x4x128xf32>
    %39 = arith.mulf %37, %38 : vector<2x4x128xf32>
    %40 = arith.addf %36, %39 : vector<2x4x128xf32>
    %41 = arith.addf %21, %40 : vector<2x4x128xf32>
    %c0_23 = arith.constant 0 : index
    %c2 = arith.constant 2 : index
    %c0_24 = arith.constant 0 : index
    %42 = vector.load %arg2[%c0_23, %c2, %c0_24] : memref<2x4x128xf32, #tpu.memory_space<vmem>>, vector<2x1x128xf32>
    %c0_25 = arith.constant 0 : index
    %c2_26 = arith.constant 2 : index
    %c0_27 = arith.constant 0 : index
    %43 = vector.load %arg3[%c0_25, %c2_26, %c0_27] : memref<2x4x128xf32, #tpu.memory_space<vmem>>, vector<2x1x128xf32>
    %c2_28 = arith.constant 2 : index
    %c0_29 = arith.constant 0 : index
    %c0_30 = arith.constant 0 : index
    %44 = vector.load %arg4[%c2_28, %c0_29, %c0_30] : memref<4x4x128xf32, #tpu.memory_space<vmem>>, vector<1x4x128xf32>
    %c2_31 = arith.constant 2 : index
    %c0_32 = arith.constant 0 : index
    %c0_33 = arith.constant 0 : index
    %45 = vector.load %arg5[%c2_31, %c0_32, %c0_33] : memref<4x4x128xf32, #tpu.memory_space<vmem>>, vector<1x4x128xf32>
    %46 = vector.broadcast %42 : vector<2x1x128xf32> to vector<2x4x128xf32>
    %47 = vector.broadcast %44 : vector<1x4x128xf32> to vector<2x4x128xf32>
    %48 = arith.mulf %46, %47 : vector<2x4x128xf32>
    %49 = vector.broadcast %43 : vector<2x1x128xf32> to vector<2x4x128xf32>
    %50 = vector.broadcast %45 : vector<1x4x128xf32> to vector<2x4x128xf32>
    %51 = arith.mulf %49, %50 : vector<2x4x128xf32>
    %52 = arith.subf %48, %51 : vector<2x4x128xf32>
    %53 = arith.addf %33, %52 : vector<2x4x128xf32>
    %54 = vector.broadcast %42 : vector<2x1x128xf32> to vector<2x4x128xf32>
    %55 = vector.broadcast %45 : vector<1x4x128xf32> to vector<2x4x128xf32>
    %56 = arith.mulf %54, %55 : vector<2x4x128xf32>
    %57 = vector.broadcast %43 : vector<2x1x128xf32> to vector<2x4x128xf32>
    %58 = vector.broadcast %44 : vector<1x4x128xf32> to vector<2x4x128xf32>
    %59 = arith.mulf %57, %58 : vector<2x4x128xf32>
    %60 = arith.addf %56, %59 : vector<2x4x128xf32>
    %61 = arith.addf %41, %60 : vector<2x4x128xf32>
    %c0_34 = arith.constant 0 : index
    %c3 = arith.constant 3 : index
    %c0_35 = arith.constant 0 : index
    %62 = vector.load %arg2[%c0_34, %c3, %c0_35] : memref<2x4x128xf32, #tpu.memory_space<vmem>>, vector<2x1x128xf32>
    %c0_36 = arith.constant 0 : index
    %c3_37 = arith.constant 3 : index
    %c0_38 = arith.constant 0 : index
    %63 = vector.load %arg3[%c0_36, %c3_37, %c0_38] : memref<2x4x128xf32, #tpu.memory_space<vmem>>, vector<2x1x128xf32>
    %c3_39 = arith.constant 3 : index
    %c0_40 = arith.constant 0 : index
    %c0_41 = arith.constant 0 : index
    %64 = vector.load %arg4[%c3_39, %c0_40, %c0_41] : memref<4x4x128xf32, #tpu.memory_space<vmem>>, vector<1x4x128xf32>
    %c3_42 = arith.constant 3 : index
    %c0_43 = arith.constant 0 : index
    %c0_44 = arith.constant 0 : index
    %65 = vector.load %arg5[%c3_42, %c0_43, %c0_44] : memref<4x4x128xf32, #tpu.memory_space<vmem>>, vector<1x4x128xf32>
    %66 = vector.broadcast %62 : vector<2x1x128xf32> to vector<2x4x128xf32>
    %67 = vector.broadcast %64 : vector<1x4x128xf32> to vector<2x4x128xf32>
    %68 = arith.mulf %66, %67 : vector<2x4x128xf32>
    %69 = vector.broadcast %63 : vector<2x1x128xf32> to vector<2x4x128xf32>
    %70 = vector.broadcast %65 : vector<1x4x128xf32> to vector<2x4x128xf32>
    %71 = arith.mulf %69, %70 : vector<2x4x128xf32>
    %72 = arith.subf %68, %71 : vector<2x4x128xf32>
    %73 = arith.addf %53, %72 : vector<2x4x128xf32>
    %74 = vector.broadcast %62 : vector<2x1x128xf32> to vector<2x4x128xf32>
    %75 = vector.broadcast %65 : vector<1x4x128xf32> to vector<2x4x128xf32>
    %76 = arith.mulf %74, %75 : vector<2x4x128xf32>
    %77 = vector.broadcast %63 : vector<2x1x128xf32> to vector<2x4x128xf32>
    %78 = vector.broadcast %64 : vector<1x4x128xf32> to vector<2x4x128xf32>
    %79 = arith.mulf %77, %78 : vector<2x4x128xf32>
    %80 = arith.addf %76, %79 : vector<2x4x128xf32>
    %81 = arith.addf %61, %80 : vector<2x4x128xf32>
    %c0_45 = arith.constant 0 : index
    %c0_46 = arith.constant 0 : index
    %c0_47 = arith.constant 0 : index
    %82 = vector.load %arg6[%c0_45, %c0_46, %c0_47] : memref<2x4x128xf32, #tpu.memory_space<vmem>>, vector<2x4x128xf32>
    tpu.vector_store %arg6[%c0_45, %c0_46, %c0_47], %73 {strides = array<i32>} : memref<2x4x128xf32, #tpu.memory_space<vmem>>, vector<2x4x128xf32>,
    %c0_48 = arith.constant 0 : index
    %c0_49 = arith.constant 0 : index
    %c0_50 = arith.constant 0 : index
    %83 = vector.load %arg7[%c0_48, %c0_49, %c0_50] : memref<2x4x128xf32, #tpu.memory_space<vmem>>, vector<2x4x128xf32>
    tpu.vector_store %arg7[%c0_48, %c0_49, %c0_50], %81 {strides = array<i32>} : memref<2x4x128xf32, #tpu.memory_space<vmem>>, vector<2x4x128xf32>,
    return
  }
  func.func @transform_0(%arg0: i32, %arg1: i32) -> (i32, i32, i32) {
    %c0_i32 = arith.constant 0 : i32
    %c0_i32_0 = arith.constant 0 : i32
    %c0_i32_1 = arith.constant 0 : i32
    return %arg1, %c0_i32, %c0_i32_0 : i32, i32, i32
  }
  func.func @transform_1(%arg0: i32, %arg1: i32) -> (i32, i32, i32) {
    %c0_i32 = arith.constant 0 : i32
    %c0_i32_0 = arith.constant 0 : i32
    %c0_i32_1 = arith.constant 0 : i32
    return %arg1, %c0_i32, %c0_i32_0 : i32, i32, i32
  }
  func.func @transform_2(%arg0: i32, %arg1: i32) -> (i32, i32, i32) {
    %c0_i32 = arith.constant 0 : i32
    %c0_i32_0 = arith.constant 0 : i32
    %c0_i32_1 = arith.constant 0 : i32
    return %c0_i32, %arg0, %c0_i32_0 : i32, i32, i32
  }
  func.func @transform_3(%arg0: i32, %arg1: i32) -> (i32, i32, i32) {
    %c0_i32 = arith.constant 0 : i32
    %c0_i32_0 = arith.constant 0 : i32
    %c0_i32_1 = arith.constant 0 : i32
    return %c0_i32, %arg0, %c0_i32_0 : i32, i32, i32
  }
  func.func @transform_4(%arg0: i32, %arg1: i32) -> (i32, i32, i32) {
    %c0_i32 = arith.constant 0 : i32
    %c0_i32_0 = arith.constant 0 : i32
    return %arg1, %arg0, %c0_i32 : i32, i32, i32
  }
  func.func @transform_5(%arg0: i32, %arg1: i32) -> (i32, i32, i32) {
    %c0_i32 = arith.constant 0 : i32
    %c0_i32_0 = arith.constant 0 : i32
    return %arg1, %arg0, %c0_i32 : i32, i32, i32
  }
}

</mosaic_0001>

<bundles_post_ra>
// kernel: tpu_custom_call.1
= control target key start
LH: loop header
LB: loop body
LE: loop exit
PB: predicated region body
PF: predicated region fallthrough
CT: control target
= control target key end

     0   :  { %11 = vsyncpa [#allocation3], 0  ;;  %s593_s0 = inlined_call_operand.hbm [shape: f32[2,4,128], index: 0, kind: input, shape index: {}]   ;;  %s594_s1 = inlined_call_operand.hbm [shape: f32[2,4,128], index: 1, kind: input, shape index: {}]   ;;  %s595_s2 = inlined_call_operand.hbm [shape: f32[4,4,128], index: 2, kind: input, shape index: {}]   ;;  %s596_s3 = inlined_call_operand.hbm [shape: f32[4,4,128], index: 3, kind: input, shape index: {}]   ;;  %s597_s4 = inlined_call_operand.hbm [shape: f32[2,4,128], index: 4, kind: output, shape index: {0}]   ;;  %s598_s5 = inlined_call_operand.hbm [shape: f32[2,4,128], index: 5, kind: output, shape index: {1}]  }
   0x1   :  { %12 = vsyncpa [#allocation6], 0 }
   0x2   :  { %13 = vsyncpa [#allocation9], 0 }
   0x3   :  { %14 = vsyncpa [#allocation4], 0 }
   0x4   :  { %15 = vsyncpa [#allocation12], 0  ;;  %s439_s18 = smov [#allocation5]   ;;  %s440_s20 = smov [#allocation2]  }
   0x5   :  { %s33_s19 = sshll.u32 %s439_s18, 4  ;;  %s21_s21 = sshll.u32 %s440_s20, 4  ;;  %s34_s19 = int_to_ptr.vmem [resolvable:$true] %s33_s19  ;;  %s477_s21 = int_to_ptr.vmem [resolvable:$true] %s21_s21 }
   0x6   :  { %s297_s24 = scalar_lea.hbm %s594_s1, 128 }
   0x7   :  { %p298_p0 = scmp.ne.s32.totalorder %s594_s1, %s297_s24  ;;  %p301_p1 = scmp.lt.u32.totalorder %s297_s24, %s594_s1 }
   0x9   :  { %p303_p2 = pnand %p301_p1, %p298_p0 }
   0xb   :  { %306 = shalt.err (!%p303_p2)
}
   0xc   :  { %s307_s29 = scalar_lea.vmem %s34_s19, 128  ;;  %p312_p4 = scmp.lt.s32.totalorder %s34_s19, %s34_s19 }
   0xd   :  { %p308_p3 = scmp.ne.s32.totalorder %s34_s19, %s307_s29  ;;  %p313_p5 = scmp.lt.s32.totalorder %s307_s29, %s307_s29 }
   0xf   :  { %p314_p6 = por %p313_p5, %p312_p4 }
  0x11   :  { %p315_p7 = pnand %p314_p6, %p308_p3 }
  0x13   :  { %318 = shalt.err (!%p315_p7)
}
  0x14   :  { %s441_s30 = smov 64   ;;  %s442_s6 = smov 4  }
  0x15   :  { %39 = dma.hbm_to_vmem [thread:$0]  %s594_s1, 128, %s34_s19, [#allocation6], %s441_s30, %s441_s30, %s442_s6  }
  0x16   :  { %s319_s11 = scalar_lea.hbm %s593_s0, 128 }
  0x17   :  { %p320_p8 = scmp.ne.s32.totalorder %s593_s0, %s319_s11  ;;  %p323_p9 = scmp.lt.u32.totalorder %s319_s11, %s593_s0 }
  0x19   :  { %p325_p10 = pnand %p323_p9, %p320_p8 }
  0x1b   :  { %328 = shalt.err (!%p325_p10)
}
  0x1c   :  { %s329_s16 = scalar_lea.vmem %s477_s21, 128  ;;  %p334_p12 = scmp.lt.s32.totalorder %s477_s21, %s477_s21 }
  0x1d   :  { %p330_p11 = scmp.ne.s32.totalorder %s477_s21, %s329_s16  ;;  %p335_p13 = scmp.lt.s32.totalorder %s329_s16, %s329_s16 }
  0x1f   :  { %p336_p0 = por %p335_p13, %p334_p12 }
  0x21   :  { %p337_p1 = pnand %p336_p0, %p330_p11 }
  0x23   :  { %340 = shalt.err (!%p337_p1)
}
  0x24   :  { %27 = dma.hbm_to_vmem [thread:$0]  %s593_s0, 128, %s477_s21, [#allocation3], %s441_s30, %s441_s30, %s442_s6  }
  0x25   :  { %s443_s18 = smov [#allocation7]   ;;  %s444_s20 = smov [#allocation8]  }
  0x26   :  { %s45_s19 = sshll.u32 %s443_s18, 4  ;;  %s57_s22 = sshll.u32 %s444_s20, 4  ;;  %s46_s19 = int_to_ptr.vmem [resolvable:$true] %s45_s19  ;;  %s514_s22 = int_to_ptr.vmem [resolvable:$true] %s57_s22 }
  0x27   :  { %s341_s25 = scalar_lea.hbm %s595_s2, 256 }
  0x28   :  { %p342_p2 = scmp.ne.s32.totalorder %s595_s2, %s341_s25  ;;  %p345_p3 = scmp.lt.u32.totalorder %s341_s25, %s595_s2 }
  0x2a   :  { %p347_p4 = pnand %p345_p3, %p342_p2 }
  0x2c   :  { %350 = shalt.err (!%p347_p4)
}
  0x2d   :  { %s351_s0 = scalar_lea.vmem %s46_s19, 256  ;;  %p356_p6 = scmp.lt.s32.totalorder %s46_s19, %s46_s19 }
  0x2e   :  { %p352_p5 = scmp.ne.s32.totalorder %s46_s19, %s351_s0  ;;  %p357_p7 = scmp.lt.s32.totalorder %s351_s0, %s351_s0 }
  0x30   :  { %p358_p8 = por %p357_p7, %p356_p6 }
  0x32   :  { %p359_p9 = pnand %p358_p8, %p352_p5 }
  0x34   :  { %362 = shalt.err (!%p359_p9)
}
  0x35   :  { %51 = dma.hbm_to_vmem [thread:$0]  %s595_s2, 256, %s46_s19, [#allocation6], %s441_s30, %s441_s30, %s442_s6  }
  0x36   :  { %s363_s10 = scalar_lea.hbm %s596_s3, 256 }
  0x37   :  { %p364_p10 = scmp.ne.s32.totalorder %s596_s3, %s363_s10  ;;  %p367_p11 = scmp.lt.u32.totalorder %s363_s10, %s596_s3 }
  0x39   :  { %p369_p12 = pnand %p367_p11, %p364_p10 }
  0x3b   :  { %372 = shalt.err (!%p369_p12)
}
  0x3c   :  { %s373_s15 = scalar_lea.vmem %s514_s22, 256  ;;  %p378_p0 = scmp.lt.s32.totalorder %s514_s22, %s514_s22 }
  0x3d   :  { %p374_p13 = scmp.ne.s32.totalorder %s514_s22, %s373_s15  ;;  %p379_p1 = scmp.lt.s32.totalorder %s373_s15, %s373_s15 }
  0x3f   :  { %p380_p2 = por %p379_p1, %p378_p0 }
  0x41   :  { %p381_p3 = pnand %p380_p2, %p374_p13 }
  0x43   :  { %384 = shalt.err (!%p381_p3)
}
  0x44   :  { %63 = dma.hbm_to_vmem [thread:$0]  %s596_s3, 256, %s514_s22, [#allocation9], %s441_s30, %s441_s30, %s442_s6  }
  0x45   :  { %429 = dma.done.wait [#allocation3], 128  }
  0x46   :  { %430 = vsyncadd [#allocation3], 4294967168 }
  0x47   :  { %431 = dma.done.wait [#allocation6], 384  }
  0x48   :  { %432 = vsyncadd [#allocation6], 4294966912 }
  0x49   :  { %433 = dma.done.wait [#allocation9], 256  }
  0x4a   :  { %434 = vsyncadd [#allocation9], 4294967040  ;;  %v273_v0 = vld [vmem:[#allocation2] ss:$0 sm:$0xff]  ;;  %v275_v1 = vld [vmem:[#allocation5] ss:$0 sm:$0xff] }
  0x4b   :  { %v551_v2 = vld [vmem:[#allocation7] sm:$0xf]  ;;  %v81_v3 = vld [vmem:[#allocation8] sm:$0xf]  ;;  %v279_v6 = vld [vmem:[#allocation5 + $0x1] ss:$0 sm:$0xff] }
  0x4c   :  { %v90_v4 = vmul.f32 %v273_v0, %v551_v2  ;;  %v277_v5 = vld [vmem:[#allocation2 + $0x1] ss:$0 sm:$0xff]  ;;  %v108_v7 = vmul.f32 %v275_v1, %v551_v2  ;;  %v100_v8 = vmul.f32 %v275_v1, %v81_v3  ;;  %v555_v9 = vld [vmem:[#allocation7 + $0x4] sm:$0xf]  ;;  %v121_v10 = vld [vmem:[#allocation8 + $0x4] sm:$0xf]  ;;  %v106_v12 = vmul.f32 %v273_v0, %v81_v3 }
  0x4d   :  { %v281_v11 = vld [vmem:[#allocation2 + $0x2] ss:$0 sm:$0xff]  ;;  %v130_v13 = vmul.f32 %v277_v5, %v555_v9  ;;  %v140_v14 = vmul.f32 %v279_v6, %v121_v10  ;;  %v283_v15 = vld [vmem:[#allocation5 + $0x2] ss:$0 sm:$0xff]  ;;  %v159_v16 = vld [vmem:[#allocation7 + $0x8] sm:$0xf]  ;;  %v146_v18 = vmul.f32 %v277_v5, %v121_v10  ;;  %v148_v19 = vmul.f32 %v279_v6, %v555_v9 }
  0x4e   :  { %v161_v17 = vld [vmem:[#allocation8 + $0x8] sm:$0xf]  ;;  %v102_v20 = vsub.f32 %v90_v4, %v100_v8  ;;  %v170_v21 = vmul.f32 %v281_v11, %v159_v16  ;;  %v285_v23 = vld [vmem:[#allocation2 + $0x3] ss:$0 sm:$0xff]  ;;  %v199_v25 = vld [vmem:[#allocation7 + $0xc] sm:$0xf]  ;;  %v110_v26 = vadd.f32 %v108_v7, %v106_v12  ;;  %v188_v57 = vmul.f32 %v283_v15, %v159_v16 }
  0x4f   :  { %v180_v22 = vmul.f32 %v283_v15, %v161_v17  ;;  %v287_v24 = vld [vmem:[#allocation5 + $0x3] ss:$0 sm:$0xff]  ;;  %v142_v27 = vsub.f32 %v130_v13, %v140_v14  ;;  %v201_v28 = vld [vmem:[#allocation8 + $0xc] sm:$0xf]  ;;  %v210_v29 = vmul.f32 %v285_v23, %v199_v25  ;;  %v274_v30 = vld [vmem:[#allocation2 + $0x4] ss:$0 sm:$0xff]  ;;  %v150_v32 = vadd.f32 %v148_v19, %v146_v18 }
  0x50   :  { %v276_v31 = vld [vmem:[#allocation5 + $0x4] ss:$0 sm:$0xff]  ;;  %v186_v33 = vmul.f32 %v281_v11, %v161_v17  ;;  %v220_v35 = vmul.f32 %v287_v24, %v201_v28  ;;  %v91_v36 = vmul.f32 %v274_v30, %v551_v2  ;;  %v278_v38 = vld [vmem:[#allocation2 + $0x5] ss:$0 sm:$0xff]  ;;  %v280_v39 = vld [vmem:[#allocation5 + $0x5] ss:$0 sm:$0xff]  ;;  %v226_v58 = vmul.f32 %v285_v23, %v201_v28 }
  0x51   :  { %v182_v34 = vsub.f32 %v170_v21, %v180_v22  ;;  %v101_v37 = vmul.f32 %v276_v31, %v81_v3  ;;  %v282_v40 = vld [vmem:[#allocation2 + $0x6] ss:$0 sm:$0xff]  ;;  %v144_v41 = vadd.f32 %v142_v27, %v102_v20  ;;  %v131_v42 = vmul.f32 %v278_v38, %v555_v9  ;;  %v284_v44 = vld [vmem:[#allocation5 + $0x6] ss:$0 sm:$0xff]  ;;  %v286_v46 = vld [vmem:[#allocation2 + $0x7] ss:$0 sm:$0xff] }
  0x52   :  { %v141_v43 = vmul.f32 %v280_v39, %v121_v10  ;;  %v171_v45 = vmul.f32 %v282_v40, %v159_v16  ;;  %v288_v47 = vld [vmem:[#allocation5 + $0x7] ss:$0 sm:$0xff]  ;;  %v222_v48 = vsub.f32 %v210_v29, %v220_v35  ;;  %v181_v50 = vmul.f32 %v284_v44, %v161_v17  ;;  %s445_s3 = smov [#allocation10]   ;;  %s446_s17 = smov [#allocation11]  }
  0x53   :  { %v103_v49 = vsub.f32 %v91_v36, %v101_v37  ;;  %v211_v51 = vmul.f32 %v286_v46, %v199_v25  ;;  %v184_v52 = vadd.f32 %v182_v34, %v144_v41  ;;  %v221_v54 = vmul.f32 %v288_v47, %v201_v28  ;;  %s243_s1 = sshll.u32 %s445_s3, 4  ;;  %s255_s18 = sshll.u32 %s446_s17, 4  ;;  %s244_s1 = int_to_ptr.vmem [resolvable:$true] %s243_s1  ;;  %s256_s18 = int_to_ptr.vmem [resolvable:$true] %s255_s18 }
  0x54   :  { %v143_v53 = vsub.f32 %v131_v42, %v141_v43  ;;  %v152_v55 = vadd.f32 %v150_v32, %v110_v26  ;;  %v183_v56 = vsub.f32 %v171_v45, %v181_v50  ;;  %v228_v59 = vmul.f32 %v287_v24, %v199_v25  ;;  %s385_s19 = scalar_lea.vmem %s244_s1, 128  ;;  %p390_p5 = scmp.lt.s32.totalorder %s244_s1, %s244_s1 }
  0x55   :  { %v224_v60 = vadd.f32 %v222_v48, %v184_v52  ;;  %v223_v62 = vsub.f32 %v211_v51, %v221_v54  ;;  %v107_v63 = vmul.f32 %v274_v30, %v81_v3  ;;  %v190_v0 = vadd.f32 %v188_v57, %v186_v33  ;;  %p386_p4 = scmp.ne.s32.totalorder %s244_s1, %s385_s19  ;;  %p391_p6 = scmp.lt.s32.totalorder %s385_s19, %s385_s19 }
  0x56   :  { %v145_v61 = vadd.f32 %v143_v53, %v103_v49  ;;  %v230_v1 = vadd.f32 %v228_v59, %v226_v58  ;;  %v109_v4 = vmul.f32 %v276_v31, %v551_v2  ;;  %v147_v5 = vmul.f32 %v278_v38, %v121_v10 }
  0x57   :  { %234 = vst [vmem:[#allocation10] sm:$0xf] %v224_v60  ;;  %v149_v7 = vmul.f32 %v280_v39, %v555_v9  ;;  %v187_v8 = vmul.f32 %v282_v40, %v161_v17  ;;  %v189_v11 = vmul.f32 %v284_v44, %v159_v16  ;;  %v192_v12 = vadd.f32 %v190_v0, %v152_v55  ;;  %p392_p7 = por %p391_p6, %p390_p5 }
  0x58   :  { %v185_v6 = vadd.f32 %v183_v56, %v145_v61  ;;  %v111_v13 = vadd.f32 %v109_v4, %v107_v63  ;;  %v227_v14 = vmul.f32 %v286_v46, %v201_v28  ;;  %v229_v15 = vmul.f32 %v288_v47, %v199_v25 }
  0x59   :  { %v151_v19 = vadd.f32 %v149_v7, %v147_v5  ;;  %v191_v3 = vadd.f32 %v189_v11, %v187_v8  ;;  %v232_v20 = vadd.f32 %v230_v1, %v192_v12  ;;  %p393_p8 = pnand %p392_p7, %p386_p4 }
  0x5a   :  { %v225_v18 = vadd.f32 %v223_v62, %v185_v6  ;;  %v231_v10 = vadd.f32 %v229_v15, %v227_v14 }
  0x5b   :  { %v153_v2 = vadd.f32 %v151_v19, %v111_v13  ;;  %236 = vst [vmem:[#allocation11] sm:$0xf] %v232_v20 }
  0x5c   :  { %235 = vst [vmem:[#allocation10 + $0x4] sm:$0xf] %v225_v18 }
  0x5d   :  { %396 = shalt.err (!%p393_p8)
}
  0x5e   :  { %s397_s23 = scalar_lea.hbm %s597_s4, 128 }
  0x5f   :  { %p398_p9 = scmp.ne.s32.totalorder %s597_s4, %s397_s23  ;;  %p401_p10 = scmp.lt.u32.totalorder %s397_s23, %s597_s4 }
  0x61   :  { %p403_p11 = pnand %p401_p10, %p398_p9 }
  0x63   :  { %406 = shalt.err (!%p403_p11)
}
  0x64   :  { %249 = dma.vmem_to_hbm [thread:$0]  %s244_s1, 128, %s597_s4, [#allocation4], %s441_s30, %s441_s30, %s442_s6   ;;  %v193_v9 = vadd.f32 %v191_v3, %v153_v2 }
  0x65   :  { %s407_s0 = scalar_lea.vmem %s256_s18, 128  ;;  %p412_p13 = scmp.lt.s32.totalorder %s256_s18, %s256_s18 }
  0x66   :  { %v233_v16 = vadd.f32 %v231_v10, %v193_v9  ;;  %p408_p12 = scmp.ne.s32.totalorder %s256_s18, %s407_s0  ;;  %p413_p0 = scmp.lt.s32.totalorder %s407_s0, %s407_s0 }
  0x68   :  { %237 = vst [vmem:[#allocation11 + $0x4] sm:$0xf] %v233_v16  ;;  %p414_p1 = por %p413_p0, %p412_p13 }
  0x6a   :  { %p415_p2 = pnand %p414_p1, %p408_p12 }
  0x6c   :  { %418 = shalt.err (!%p415_p2)
}
  0x6d   :  { %s419_s8 = scalar_lea.hbm %s598_s5, 128 }
  0x6e   :  { %p420_p3 = scmp.ne.s32.totalorder %s598_s5, %s419_s8  ;;  %p423_p4 = scmp.lt.u32.totalorder %s419_s8, %s598_s5 }
  0x70   :  { %p425_p5 = pnand %p423_p4, %p420_p3 }
  0x72   :  { %428 = shalt.err (!%p425_p5)
}
  0x73   :  { %261 = dma.vmem_to_hbm [thread:$0]  %s256_s18, 128, %s598_s5, [#allocation12], %s441_s30, %s441_s30, %s442_s6  }
  0x74   :  { %435 = dma.done.wait [#allocation4], 128  }
  0x75   :  { %436 = vsyncadd [#allocation4], 4294967168 }
  0x76   :  { %437 = dma.done.wait [#allocation12], 128  }
  0x77   :  { %438 = vsyncadd [#allocation12], 4294967168 }
  0x78   :  { %268 = vsyncpa [#allocation3], 1 }
  0x79   :  { %269 = vsyncpa [#allocation6], 1 }
  0x7a   :  { %270 = vsyncpa [#allocation9], 1 }
  0x7b   :  { %271 = vsyncpa [#allocation4], 1 }
  0x7c   :  { %272 = vsyncpa [#allocation12], 1 }

</bundles_post_ra>
